<compile_context>
chip_gen: v5e
topology: v5e:2x2
jax: 0.10.0
libtpu: 0.0.40
codegen_flags: <defaults>
</compile_context>

<pallas_src>
import functools

import jax
import jax.numpy as jnp
from jax import lax
from jax.experimental import pallas as pl
from jax.experimental.pallas import tpu as pltpu

NEG_SLOPE = 0.01     # nn.LeakyReLU() default negative_slope
LANE = 128           # TPU lane width (last-dim quantum)
MID_UNROLL_MAX = 4   # statically unroll up to this many hidden->hidden layers


def _round_up(x: int, m: int) -> int:
    return (x + m - 1) // m * m


def _cdiv(a: int, b: int) -> int:
    return (a + b - 1) // b


def _sublane(dtype) -> int:
    # sublane quantum: 8 for 4-byte, 16 for 2-byte, 32 for 1-byte dtypes
    return 8 * max(1, 4 // jnp.dtype(dtype).itemsize)


def _vmem_budget_bytes() -> int:
    """Generation-aware usable-VMEM budget for this kernel."""
    try:
        kind = jax.devices()[0].device_kind.lower()
    except Exception:
        kind = ""
    if "v7" in kind or "7x" in kind:
        return 56 * 1024 * 1024          # v7x: 64 MiB physical per TensorCore
    if any(t in kind for t in ("v3", "v4", "v5", "v6")):
        return 100 * 1024 * 1024         # v5e / v6e: 128 MiB physical
    return 56 * 1024 * 1024              # unknown: be conservative


# ----------------------------------------------------------------------------
# Kernel: whole MLP on one [tm, din_pad] activation tile; weights VMEM-resident.
# ----------------------------------------------------------------------------
def _leaky_relu(y):
    return jnp.where(y > 0, y, NEG_SLOPE * y)


def _fused_mlp_kernel(x_ref, *rest, has_first: bool, num_mid: int):
    """rest = ([w_first, b_first]?, [w_mid, b_mid]?, w_last, b_last, o_ref).

    Weights are pre-transposed to [in, out] (per-layer lane-dense padding);
    biases are f32 [.., 1, out].  Matmul operands stay in the packed dtype
    (bf16 stays bf16 -> MXU rate); accumulation / bias / activation are f32.
    """
    o_ref = rest[-1]
    refs = rest[:-1]
    i = 0
    act = x_ref[...]                                   # native dtype

    if has_first:
        w, b = refs[i], refs[i + 1]
        i += 2
        y = jnp.dot(act.astype(w.dtype), w[...],
                    preferred_element_type=jnp.float32) + b[...]
        act = _leaky_relu(y)                           # f32 epilogue

    if num_mid > 0:
        w_mid, b_mid = refs[i], refs[i + 1]
        i += 2
        wdtype = w_mid.dtype

        def one_layer(a, l):
            y = jnp.dot(a.astype(wdtype), w_mid[l],
                        preferred_element_type=jnp.float32) + b_mid[l]
            return _leaky_relu(y)

        if num_mid <= MID_UNROLL_MAX:
            for l in range(num_mid):                   # short, static unroll
                act = one_layer(act, l)
        else:
            # deep stack: fori_loop keeps vreg live ranges flat per layer;
            # dynamic w_mid[l] indexing into the VMEM-resident stack is cheap.
            act = lax.fori_loop(0, num_mid,
                                lambda l, a: one_layer(a, l),
                                act.astype(jnp.float32))

    w, b = refs[i], refs[i + 1]                        # final Linear, no activation
    y = jnp.dot(act.astype(w.dtype), w[...],
                preferred_element_type=jnp.float32) + b[...]
    o_ref[...] = y.astype(o_ref.dtype)


# ----------------------------------------------------------------------------
# Parameter init / packing
# ----------------------------------------------------------------------------
def init_mlp_params(key, in_size, out_size, hidden_size, num_layers,
                    dtype=jnp.float32):
    """PyTorch nn.Linear-style init (uniform +/- 1/sqrt(fan_in)).
    Returns a list of (weight [out, in], bias [out]) per layer."""
    dims = [in_size] + [hidden_size] * (num_layers - 1) + [out_size]
    params = []
    for i in range(num_layers):
        fan_in, fan_out = dims[i], dims[i + 1]
        key, kw, kb = jax.random.split(key, 3)
        bound = 1.0 / (fan_in ** 0.5)
        w = jax.random.uniform(kw, (fan_out, fan_in), dtype, -bound, bound)
        b = jax.random.uniform(kb, (fan_out,), dtype, -bound, bound)
        params.append((w, b))
    return params


def pack_mlp_params(params, dtype=None):
    """One-time pack: transpose each weight to [in, out] and zero-pad PER LAYER
    to lane-dense (multiple-of-128) widths.  Middle hidden->hidden layers are
    stacked into one [L-2, h_pad, h_pad] tensor so a fori_loop can walk them.

    Returns (inputs, meta): `inputs` is the flat list of arrays passed to the
    pallas_call right after x; `meta` carries the static structure."""
    if dtype is None:
        dtype = params[0][0].dtype
    num_layers = len(params)

    def pad_wb(w, b):
        dout, din = w.shape
        din_p, dout_p = _round_up(din, LANE), _round_up(dout, LANE)
        wp = jnp.zeros((din_p, dout_p), dtype).at[:din, :dout].set(w.T.astype(dtype))
        bp = jnp.zeros((1, dout_p), jnp.float32).at[0, :dout].set(b.astype(jnp.float32))
        return wp, bp

    inputs = []
    has_first = num_layers >= 2
    if has_first:
        wf, bf = pad_wb(*params[0])
        inputs += [wf, bf]
    num_mid = max(num_layers - 2, 0)
    if num_mid > 0:
        mids = [pad_wb(w, b) for (w, b) in params[1:-1]]
        inputs += [jnp.stack([m[0] for m in mids]),
                   jnp.stack([m[1] for m in mids])]
    wl, bl = pad_wb(*params[-1])
    inputs += [wl, bl]

    meta = dict(has_first=has_first, num_mid=num_mid,
                in_size=params[0][0].shape[1], out_size=params[-1][0].shape[0])
    return inputs, meta


# ----------------------------------------------------------------------------
# Fused forward
# ----------------------------------------------------------------------------
def mlp_forward_fused(x, packed, meta):
    batch, in_size = x.shape
    assert in_size == meta["in_size"]
    out_size = meta["out_size"]
    weights = packed[0::2]

    din_pad = weights[0].shape[-2]
    dout_pad = weights[-1].shape[-1]
    max_width = max(max(w.shape[-1] for w in weights), din_pad)
    act_itemsize = jnp.dtype(x.dtype).itemsize

    # ---- batch tile: dtype-correct sublane, large tiles, >=2 tiles when the
    #      batch allows it (feeds both v7x TensorCores). ----------------------
    sub = _sublane(x.dtype)
    desired = 512
    half = _round_up(max(_cdiv(batch, 2), 1), sub)
    tm = max(sub, min(desired, half, _round_up(batch, sub)))

    # ---- generation-aware VMEM budget check. --------------------------------
    budget = _vmem_budget_bytes()
    # conservative: assume 2 buffers even if single-buffering succeeds below
    weight_bytes = 2 * sum(int(a.size) * jnp.dtype(a.dtype).itemsize for a in packed)
    if weight_bytes > budget:
        # TODO(synk): layer-streaming fallback (extra "arbitrary" grid axis over
        # layers with the activation carried in VMEM scratch, or
        # pltpu.emit_pipeline over the layer stack) for weight stacks that do
        # not fit v7x's 64 MiB VMEM.
        raise NotImplementedError(
            f"resident weight stack ({weight_bytes / 2**20:.1f} MiB) exceeds the "
            f"VMEM budget ({budget / 2**20:.1f} MiB); layer streaming not implemented")

    def tile_bytes(t):
        return (2 * t * din_pad * act_itemsize        # double-buffered input tile
                + 2 * t * dout_pad * act_itemsize     # double-buffered output tile
                + 6 * t * max_width * 4)              # f32 intermediates / margin

    while tm > sub and weight_bytes + tile_bytes(tm) > budget:
        tm = max(sub, _round_up(tm // 2, sub))

    b_pad = _round_up(batch, tm)
    grid = (b_pad // tm,)

    # ---- pad the activation only when actually needed (skip the extra HBM
    #      round-trip if batch/features are already aligned). -----------------
    if (b_pad, din_pad) != (batch, in_size):
        x_in = jnp.pad(x, ((0, b_pad - batch), (0, din_pad - in_size)))
    else:
        x_in = x

    cost = pl.CostEstimate(
        flops=int(2 * b_pad * sum(int(w.size) for w in weights)),
        transcendentals=0,
        bytes_accessed=int(
            int(x_in.size) * act_itemsize
            + sum(int(a.size) * jnp.dtype(a.dtype).itemsize for a in packed)
            + b_pad * dout_pad * act_itemsize),
    )

    def build(single_buffer_weights: bool):
        def const_spec(a):
            kwargs = {}
            if single_buffer_weights:
                # constant index_map -> double-buffering buys nothing
                kwargs["pipeline_mode"] = pl.Buffered(1)
            return pl.BlockSpec(a.shape, lambda i, n=a.ndim: (0,) * n, **kwargs)

        return pl.pallas_call(
            functools.partial(_fused_mlp_kernel,
                              has_first=meta["has_first"],
                              num_mid=meta["num_mid"]),
            out_shape=jax.ShapeDtypeStruct((b_pad, dout_pad), x.dtype),
            grid=grid,
            in_specs=[pl.BlockSpec((tm, din_pad), lambda i: (i, 0))]
                     + [const_spec(a) for a in packed],
            out_specs=pl.BlockSpec((tm, dout_pad), lambda i: (i, 0)),
            compiler_params=pltpu.CompilerParams(
                dimension_semantics=("parallel",),    # batch tiles shard across TCs
                vmem_limit_bytes=budget,
            ),
            cost_estimate=cost,
        )

    try:
        out_pad = build(single_buffer_weights=True)(x_in, *packed)
    except Exception:
        # pipeline_mode=pl.Buffered(1) unsupported on this jax/libtpu build:
        # fall back to default (double-buffered) resident weights.
        out_pad = build(single_buffer_weights=False)(x_in, *packed)

    return out_pad[:batch, :out_size]


# ----------------------------------------------------------------------------
# Pure-JAX references
# ----------------------------------------------------------------------------
def mlp_reference(x, params):
    n = len(params)
    for i, (w, b) in enumerate(params):
        x = x @ w.T + b
        if i < n - 1:
            x = jnp.where(x > 0, x, NEG_SLOPE * x)
    return x


def mlp_reference_kernel_numerics(x, params, wdtype):
    """Mirrors the kernel's mixed precision (operands cast to `wdtype`,
    f32 accumulation/epilogue) to validate low-precision packs."""
    n = len(params)
    act = x
    for i, (w, b) in enumerate(params):
        y = jnp.dot(act.astype(wdtype), w.T.astype(wdtype),
                    preferred_element_type=jnp.float32) + b.astype(jnp.float32)
        act = jnp.where(y > 0, y, NEG_SLOPE * y) if i < n - 1 else y
    return act


if __name__ == "__main__":
    key = jax.random.PRNGKey(0)

    # --- Config A: tiny f32 MLP (strict check vs. the pure-f32 reference) ----
    in_size, out_size, hidden, layers, batch = 16, 8, 32, 3, 8
    key, kx, kp = jax.random.split(key, 3)
    x = jax.random.normal(kx, (batch, in_size), dtype=jnp.float32)
    params = init_mlp_params(kp, in_size, out_size, hidden, layers)
    packed, meta = pack_mlp_params(params)                       # f32 pack
    out = jax.block_until_ready(mlp_forward_fused(x, packed, meta))
    ref = mlp_reference(x, params)
    assert out.shape == (batch, out_size)
    assert jnp.allclose(out, ref, atol=1e-5, rtol=1e-5), float(
        jnp.max(jnp.abs(out - ref)))

    # --- Config B: deeper MLP with bf16 weights/operands; exercises the
    #     fori_loop middle-layer path, batch tiling and per-layer padding. ----
    in_size, out_size, hidden, layers, batch = 40, 24, 256, 8, 300
    key, kx, kp = jax.random.split(key, 3)
    xb = jax.random.normal(kx, (batch, in_size), dtype=jnp.float32)
    params_b = init_mlp_params(kp, in_size, out_size, hidden, layers)
    packed_b, meta_b = pack_mlp_params(params_b, dtype=jnp.bfloat16)
    out_b = jax.block_until_ready(mlp_forward_fused(xb, packed_b, meta_b))
    ref_b = mlp_reference_kernel_numerics(xb, params_b, jnp.bfloat16)
    assert out_b.shape == (batch, out_size)
    assert jnp.allclose(out_b, ref_b, atol=1e-4, rtol=1e-3), float(
        jnp.max(jnp.abs(out_b - ref_b)))

    print("KERNEL_OK")
</pallas_src>

<mosaic_0001>
module attributes {stable_mosaic.version = 11 : i64} {
  func.func @_fused_mlp_kernel(%arg0: i32, %arg1: memref<8x128xf32, #tpu.memory_space<vmem>>, %arg2: memref<128x128xf32, #tpu.memory_space<vmem>>, %arg3: memref<1x128xf32, #tpu.memory_space<vmem>>, %arg4: memref<1x128x128xf32, #tpu.memory_space<vmem>>, %arg5: memref<1x1x128xf32, #tpu.memory_space<vmem>>, %arg6: memref<128x128xf32, #tpu.memory_space<vmem>>, %arg7: memref<1x128xf32, #tpu.memory_space<vmem>>, %arg8: memref<8x128xf32, #tpu.memory_space<vmem>>) attributes {dimension_semantics = [#tpu.dimension_semantics<parallel>], iteration_bounds = array<i64: 1>, scalar_prefetch = 0 : i64, scratch_operands = 0 : i64, tpu.core_type = #tpu.core_type<tc>, window_params = [{transform_indices = @transform_0, window_bounds = array<i64: 8, 128>}, {pipeline_mode = #tpu.pipeline_mode<synchronous>, transform_indices = @transform_1, window_bounds = array<i64: 128, 128>}, {pipeline_mode = #tpu.pipeline_mode<synchronous>, transform_indices = @transform_2, window_bounds = array<i64: 1, 128>}, {pipeline_mode = #tpu.pipeline_mode<synchronous>, transform_indices = @transform_3, window_bounds = array<i64: 1, 128, 128>}, {pipeline_mode = #tpu.pipeline_mode<synchronous>, transform_indices = @transform_4, window_bounds = array<i64: 1, 1, 128>}, {pipeline_mode = #tpu.pipeline_mode<synchronous>, transform_indices = @transform_5, window_bounds = array<i64: 128, 128>}, {pipeline_mode = #tpu.pipeline_mode<synchronous>, transform_indices = @transform_6, window_bounds = array<i64: 1, 128>}, {transform_indices = @transform_7, window_bounds = array<i64: 8, 128>}]} {
    %c0 = arith.constant 0 : index
    %c0_0 = arith.constant 0 : index
    %0 = vector.load %arg1[%c0, %c0_0] : memref<8x128xf32, #tpu.memory_space<vmem>>, vector<8x128xf32>
    %c0_1 = arith.constant 0 : index
    %c0_2 = arith.constant 0 : index
    %1 = vector.load %arg2[%c0_1, %c0_2] : memref<128x128xf32, #tpu.memory_space<vmem>>, vector<128x128xf32>
    %cst = arith.constant dense<0.000000e+00> : vector<8x128xf32>
    %2 = tpu.matmul %0, %1, %cst {dimension_numbers = #tpu.dot_dimension_numbers<[1], [0], [0], [1], [0, 0, 1, 1], [], []>} : vector<8x128xf32>, vector<128x128xf32>, vector<8x128xf32> -> vector<8x128xf32>
    %c0_3 = arith.constant 0 : index
    %c0_4 = arith.constant 0 : index
    %3 = vector.load %arg3[%c0_3, %c0_4] : memref<1x128xf32, #tpu.memory_space<vmem>>, vector<1x128xf32>
    %4 = vector.broadcast %3 : vector<1x128xf32> to vector<8x128xf32>
    %5 = arith.addf %2, %4 : vector<8x128xf32>
    %cst_5 = arith.constant 0.000000e+00 : f32
    %6 = vector.broadcast %cst_5 : f32 to vector<8x128xf32>
    %7 = arith.cmpf ogt, %5, %6 : vector<8x128xf32>
    %cst_6 = arith.constant 0.00999999977 : f32
    %8 = vector.broadcast %cst_6 : f32 to vector<8x128xf32>
    %9 = arith.mulf %8, %5 : vector<8x128xf32>
    %10 = arith.select %7, %5, %9 : vector<8x128xi1>, vector<8x128xf32>
    %c0_7 = arith.constant 0 : index
    %c0_8 = arith.constant 0 : index
    %c0_9 = arith.constant 0 : index
    %11 = vector.load %arg4[%c0_7, %c0_8, %c0_9] : memref<1x128x128xf32, #tpu.memory_space<vmem>>, vector<1x128x128xf32>
    %12 = vector.shape_cast %11 : vector<1x128x128xf32> to vector<128x128xf32>
    %cst_10 = arith.constant dense<0.000000e+00> : vector<8x128xf32>
    %13 = tpu.matmul %10, %12, %cst_10 {dimension_numbers = #tpu.dot_dimension_numbers<[1], [0], [0], [1], [0, 0, 1, 1], [], []>} : vector<8x128xf32>, vector<128x128xf32>, vector<8x128xf32> -> vector<8x128xf32>
    %c0_11 = arith.constant 0 : index
    %c0_12 = arith.constant 0 : index
    %c0_13 = arith.constant 0 : index
    %14 = vector.load %arg5[%c0_11, %c0_12, %c0_13] : memref<1x1x128xf32, #tpu.memory_space<vmem>>, vector<1x1x128xf32>
    %15 = vector.shape_cast %14 : vector<1x1x128xf32> to vector<1x128xf32>
    %16 = vector.broadcast %15 : vector<1x128xf32> to vector<8x128xf32>
    %17 = arith.addf %13, %16 : vector<8x128xf32>
    %cst_14 = arith.constant 0.000000e+00 : f32
    %18 = vector.broadcast %cst_14 : f32 to vector<8x128xf32>
    %19 = arith.cmpf ogt, %17, %18 : vector<8x128xf32>
    %cst_15 = arith.constant 0.00999999977 : f32
    %20 = vector.broadcast %cst_15 : f32 to vector<8x128xf32>
    %21 = arith.mulf %20, %17 : vector<8x128xf32>
    %22 = arith.select %19, %17, %21 : vector<8x128xi1>, vector<8x128xf32>
    %c0_16 = arith.constant 0 : index
    %c0_17 = arith.constant 0 : index
    %23 = vector.load %arg6[%c0_16, %c0_17] : memref<128x128xf32, #tpu.memory_space<vmem>>, vector<128x128xf32>
    %cst_18 = arith.constant dense<0.000000e+00> : vector<8x128xf32>
    %24 = tpu.matmul %22, %23, %cst_18 {dimension_numbers = #tpu.dot_dimension_numbers<[1], [0], [0], [1], [0, 0, 1, 1], [], []>} : vector<8x128xf32>, vector<128x128xf32>, vector<8x128xf32> -> vector<8x128xf32>
    %c0_19 = arith.constant 0 : index
    %c0_20 = arith.constant 0 : index
    %25 = vector.load %arg7[%c0_19, %c0_20] : memref<1x128xf32, #tpu.memory_space<vmem>>, vector<1x128xf32>
    %26 = vector.broadcast %25 : vector<1x128xf32> to vector<8x128xf32>
    %27 = arith.addf %24, %26 : vector<8x128xf32>
    %c0_21 = arith.constant 0 : index
    %c0_22 = arith.constant 0 : index
    %28 = vector.load %arg8[%c0_21, %c0_22] : memref<8x128xf32, #tpu.memory_space<vmem>>, vector<8x128xf32>
    tpu.vector_store %arg8[%c0_21, %c0_22], %27 {strides = array<i32>} : memref<8x128xf32, #tpu.memory_space<vmem>>, vector<8x128xf32>,
    return
  }
  func.func @transform_0(%arg0: i32) -> (i32, i32) {
    %c0_i32 = arith.constant 0 : i32
    %c0_i32_0 = arith.constant 0 : i32
    return %arg0, %c0_i32 : i32, i32
  }
  func.func @transform_1(%arg0: i32) -> (i32, i32) {
    %c0_i32 = arith.constant 0 : i32
    %c0_i32_0 = arith.constant 0 : i32
    %c0_i32_1 = arith.constant 0 : i32
    return %c0_i32, %c0_i32_0 : i32, i32
  }
  func.func @transform_2(%arg0: i32) -> (i32, i32) {
    %c0_i32 = arith.constant 0 : i32
    %c0_i32_0 = arith.constant 0 : i32
    %c0_i32_1 = arith.constant 0 : i32
    return %c0_i32, %c0_i32_0 : i32, i32
  }
  func.func @transform_3(%arg0: i32) -> (i32, i32, i32) {
    %c0_i32 = arith.constant 0 : i32
    %c0_i32_0 = arith.constant 0 : i32
    %c0_i32_1 = arith.constant 0 : i32
    %c0_i32_2 = arith.constant 0 : i32
    return %c0_i32, %c0_i32_0, %c0_i32_1 : i32, i32, i32
  }
  func.func @transform_4(%arg0: i32) -> (i32, i32, i32) {
    %c0_i32 = arith.constant 0 : i32
    %c0_i32_0 = arith.constant 0 : i32
    %c0_i32_1 = arith.constant 0 : i32
    %c0_i32_2 = arith.constant 0 : i32
    return %c0_i32, %c0_i32_0, %c0_i32_1 : i32, i32, i32
  }
  func.func @transform_5(%arg0: i32) -> (i32, i32) {
    %c0_i32 = arith.constant 0 : i32
    %c0_i32_0 = arith.constant 0 : i32
    %c0_i32_1 = arith.constant 0 : i32
    return %c0_i32, %c0_i32_0 : i32, i32
  }
  func.func @transform_6(%arg0: i32) -> (i32, i32) {
    %c0_i32 = arith.constant 0 : i32
    %c0_i32_0 = arith.constant 0 : i32
    %c0_i32_1 = arith.constant 0 : i32
    return %c0_i32, %c0_i32_0 : i32, i32
  }
  func.func @transform_7(%arg0: i32) -> (i32, i32) {
    %c0_i32 = arith.constant 0 : i32
    %c0_i32_0 = arith.constant 0 : i32
    return %arg0, %c0_i32 : i32, i32
  }
}

module attributes {stable_mosaic.version = 11 : i64} {
  func.func @_fused_mlp_kernel(%arg0: i32, %arg1: memref<8x128xf32, #tpu.memory_space<vmem>>, %arg2: memref<128x128xf32, #tpu.memory_space<vmem>>, %arg3: memref<1x128xf32, #tpu.memory_space<vmem>>, %arg4: memref<1x128x128xf32, #tpu.memory_space<vmem>>, %arg5: memref<1x1x128xf32, #tpu.memory_space<vmem>>, %arg6: memref<128x128xf32, #tpu.memory_space<vmem>>, %arg7: memref<1x128xf32, #tpu.memory_space<vmem>>, %arg8: memref<8x128xf32, #tpu.memory_space<vmem>>) attributes {dimension_semantics = [#tpu.dimension_semantics<parallel>], iteration_bounds = array<i64: 1>, scalar_prefetch = 0 : i64, scratch_operands = 0 : i64, tpu.core_type = #tpu.core_type<tc>, window_params = [{transform_indices = @transform_0, window_bounds = array<i64: 8, 128>}, {pipeline_mode = #tpu.pipeline_mode<synchronous>, transform_indices = @transform_1, window_bounds = array<i64: 128, 128>}, {pipeline_mode = #tpu.pipeline_mode<synchronous>, transform_indices = @transform_2, window_bounds = array<i64: 1, 128>}, {pipeline_mode = #tpu.pipeline_mode<synchronous>, transform_indices = @transform_3, window_bounds = array<i64: 1, 128, 128>}, {pipeline_mode = #tpu.pipeline_mode<synchronous>, transform_indices = @transform_4, window_bounds = array<i64: 1, 1, 128>}, {pipeline_mode = #tpu.pipeline_mode<synchronous>, transform_indices = @transform_5, window_bounds = array<i64: 128, 128>}, {pipeline_mode = #tpu.pipeline_mode<synchronous>, transform_indices = @transform_6, window_bounds = array<i64: 1, 128>}, {transform_indices = @transform_7, window_bounds = array<i64: 8, 128>}]} {
    %c0 = arith.constant 0 : index
    %c0_0 = arith.constant 0 : index
    %0 = vector.load %arg1[%c0, %c0_0] : memref<8x128xf32, #tpu.memory_space<vmem>>, vector<8x128xf32>
    %c0_1 = arith.constant 0 : index
    %c0_2 = arith.constant 0 : index
    %1 = vector.load %arg2[%c0_1, %c0_2] : memref<128x128xf32, #tpu.memory_space<vmem>>, vector<128x128xf32>
    %cst = arith.constant dense<0.000000e+00> : vector<8x128xf32>
    %2 = tpu.matmul %0, %1, %cst {dimension_numbers = #tpu.dot_dimension_numbers<[1], [0], [0], [1], [0, 0, 1, 1], [], []>} : vector<8x128xf32>, vector<128x128xf32>, vector<8x128xf32> -> vector<8x128xf32>
    %c0_3 = arith.constant 0 : index
    %c0_4 = arith.constant 0 : index
    %3 = vector.load %arg3[%c0_3, %c0_4] : memref<1x128xf32, #tpu.memory_space<vmem>>, vector<1x128xf32>
    %4 = vector.broadcast %3 : vector<1x128xf32> to vector<8x128xf32>
    %5 = arith.addf %2, %4 : vector<8x128xf32>
    %cst_5 = arith.constant 0.000000e+00 : f32
    %6 = vector.broadcast %cst_5 : f32 to vector<8x128xf32>
    %7 = arith.cmpf ogt, %5, %6 : vector<8x128xf32>
    %cst_6 = arith.constant 0.00999999977 : f32
    %8 = vector.broadcast %cst_6 : f32 to vector<8x128xf32>
    %9 = arith.mulf %8, %5 : vector<8x128xf32>
    %10 = arith.select %7, %5, %9 : vector<8x128xi1>, vector<8x128xf32>
    %c0_7 = arith.constant 0 : index
    %c0_8 = arith.constant 0 : index
    %c0_9 = arith.constant 0 : index
    %11 = vector.load %arg4[%c0_7, %c0_8, %c0_9] : memref<1x128x128xf32, #tpu.memory_space<vmem>>, vector<1x128x128xf32>
    %12 = vector.shape_cast %11 : vector<1x128x128xf32> to vector<128x128xf32>
    %cst_10 = arith.constant dense<0.000000e+00> : vector<8x128xf32>
    %13 = tpu.matmul %10, %12, %cst_10 {dimension_numbers = #tpu.dot_dimension_numbers<[1], [0], [0], [1], [0, 0, 1, 1], [], []>} : vector<8x128xf32>, vector<128x128xf32>, vector<8x128xf32> -> vector<8x128xf32>
    %c0_11 = arith.constant 0 : index
    %c0_12 = arith.constant 0 : index
    %c0_13 = arith.constant 0 : index
    %14 = vector.load %arg5[%c0_11, %c0_12, %c0_13] : memref<1x1x128xf32, #tpu.memory_space<vmem>>, vector<1x1x128xf32>
    %15 = vector.shape_cast %14 : vector<1x1x128xf32> to vector<1x128xf32>
    %16 = vector.broadcast %15 : vector<1x128xf32> to vector<8x128xf32>
    %17 = arith.addf %13, %16 : vector<8x128xf32>
    %cst_14 = arith.constant 0.000000e+00 : f32
    %18 = vector.broadcast %cst_14 : f32 to vector<8x128xf32>
    %19 = arith.cmpf ogt, %17, %18 : vector<8x128xf32>
    %cst_15 = arith.constant 0.00999999977 : f32
    %20 = vector.broadcast %cst_15 : f32 to vector<8x128xf32>
    %21 = arith.mulf %20, %17 : vector<8x128xf32>
    %22 = arith.select %19, %17, %21 : vector<8x128xi1>, vector<8x128xf32>
    %c0_16 = arith.constant 0 : index
    %c0_17 = arith.constant 0 : index
    %23 = vector.load %arg6[%c0_16, %c0_17] : memref<128x128xf32, #tpu.memory_space<vmem>>, vector<128x128xf32>
    %cst_18 = arith.constant dense<0.000000e+00> : vector<8x128xf32>
    %24 = tpu.matmul %22, %23, %cst_18 {dimension_numbers = #tpu.dot_dimension_numbers<[1], [0], [0], [1], [0, 0, 1, 1], [], []>} : vector<8x128xf32>, vector<128x128xf32>, vector<8x128xf32> -> vector<8x128xf32>
    %c0_19 = arith.constant 0 : index
    %c0_20 = arith.constant 0 : index
    %25 = vector.load %arg7[%c0_19, %c0_20] : memref<1x128xf32, #tpu.memory_space<vmem>>, vector<1x128xf32>
    %26 = vector.broadcast %25 : vector<1x128xf32> to vector<8x128xf32>
    %27 = arith.addf %24, %26 : vector<8x128xf32>
    %c0_21 = arith.constant 0 : index
    %c0_22 = arith.constant 0 : index
    %28 = vector.load %arg8[%c0_21, %c0_22] : memref<8x128xf32, #tpu.memory_space<vmem>>, vector<8x128xf32>
    tpu.vector_store %arg8[%c0_21, %c0_22], %27 {strides = array<i32>} : memref<8x128xf32, #tpu.memory_space<vmem>>, vector<8x128xf32>,
    return
  }
  func.func @transform_0(%arg0: i32) -> (i32, i32) {
    %c0_i32 = arith.constant 0 : i32
    %c0_i32_0 = arith.constant 0 : i32
    return %arg0, %c0_i32 : i32, i32
  }
  func.func @transform_1(%arg0: i32) -> (i32, i32) {
    %c0_i32 = arith.constant 0 : i32
    %c0_i32_0 = arith.constant 0 : i32
    %c0_i32_1 = arith.constant 0 : i32
    return %c0_i32, %c0_i32_0 : i32, i32
  }
  func.func @transform_2(%arg0: i32) -> (i32, i32) {
    %c0_i32 = arith.constant 0 : i32
    %c0_i32_0 = arith.constant 0 : i32
    %c0_i32_1 = arith.constant 0 : i32
    return %c0_i32, %c0_i32_0 : i32, i32
  }
  func.func @transform_3(%arg0: i32) -> (i32, i32, i32) {
    %c0_i32 = arith.constant 0 : i32
    %c0_i32_0 = arith.constant 0 : i32
    %c0_i32_1 = arith.constant 0 : i32
    %c0_i32_2 = arith.constant 0 : i32
    return %c0_i32, %c0_i32_0, %c0_i32_1 : i32, i32, i32
  }
  func.func @transform_4(%arg0: i32) -> (i32, i32, i32) {
    %c0_i32 = arith.constant 0 : i32
    %c0_i32_0 = arith.constant 0 : i32
    %c0_i32_1 = arith.constant 0 : i32
    %c0_i32_2 = arith.constant 0 : i32
    return %c0_i32, %c0_i32_0, %c0_i32_1 : i32, i32, i32
  }
  func.func @transform_5(%arg0: i32) -> (i32, i32) {
    %c0_i32 = arith.constant 0 : i32
    %c0_i32_0 = arith.constant 0 : i32
    %c0_i32_1 = arith.constant 0 : i32
    return %c0_i32, %c0_i32_0 : i32, i32
  }
  func.func @transform_6(%arg0: i32) -> (i32, i32) {
    %c0_i32 = arith.constant 0 : i32
    %c0_i32_0 = arith.constant 0 : i32
    %c0_i32_1 = arith.constant 0 : i32
    return %c0_i32, %c0_i32_0 : i32, i32
  }
  func.func @transform_7(%arg0: i32) -> (i32, i32) {
    %c0_i32 = arith.constant 0 : i32
    %c0_i32_0 = arith.constant 0 : i32
    return %arg0, %c0_i32 : i32, i32
  }
}

</mosaic_0001>

<bundles_post_ra>
// kernel: tpu_custom_call.1
= control target key start
LH: loop header
LB: loop body
LE: loop exit
PB: predicated region body
PF: predicated region fallthrough
CT: control target
= control target key end

     0   :  { %12 = vsyncpa [#allocation3], 0  ;;  %s444_s0 = inlined_call_operand.hbm [shape: f32[8,128], index: 0, kind: input, shape index: {}]   ;;  %s445_s1 = inlined_call_operand.hbm [shape: f32[128,128], index: 1, kind: input, shape index: {}]   ;;  %s446_s2 = inlined_call_operand.vmem [shape: f32[1,128], index: 2, kind: input, shape index: {}]   ;;  %s447_s3 = inlined_call_operand.hbm [shape: f32[1,128,128], index: 3, kind: input, shape index: {}]   ;;  %s448_s4 = inlined_call_operand.vmem [shape: f32[1,1,128], index: 4, kind: input, shape index: {}]   ;;  %s449_s5 = inlined_call_operand.hbm [shape: f32[128,128], index: 5, kind: input, shape index: {}]   ;;  %s450_s6 = inlined_call_operand.vmem [shape: f32[1,128], index: 6, kind: input, shape index: {}]   ;;  %s451_s7 = inlined_call_operand.hbm [shape: f32[8,128], index: 7, kind: output, shape index: {}]  }
   0x1   :  { %13 = vsyncpa [#allocation6], 0 }
   0x2   :  { %14 = vsyncpa [#allocation9], 0  ;;  %s31_s26 = sshll.u32 %s445_s1, 4  ;;  %s32_s26 = int_to_ptr.hbm [resolvable:$true] %s31_s26 }
   0x3   :  { %15 = vsyncpa [#allocation4], 0  ;;  %s373_s27 = smov [#allocation5]   ;;  %s21_s8 = sshll.u32 %s444_s0, 4  ;;  %s22_s8 = int_to_ptr.hbm [resolvable:$true] %s21_s8 }
   0x4   :  { %s33_s28 = sshll.u32 %s373_s27, 4  ;;  %s374_s9 = smov 128   ;;  %s34_s28 = int_to_ptr.vmem [resolvable:$true] %s33_s28 }
   0x5   :  { %s375_s10 = smov 8   ;;  %s376_s11 = smov [#allocation2]  }
   0x6   :  { %39 = dma.hbm_to_vmem [thread:$0]  %s32_s26, 2048, %s34_s28, [#allocation6], %s374_s9, %s374_s9, %s375_s10  }
   0x7   :  { %s23_s12 = sshll.u32 %s376_s11, 4  ;;  %s46_s15 = sshll.u32 %s447_s3, 4  ;;  %s24_s12 = int_to_ptr.vmem [resolvable:$true] %s23_s12  ;;  %s47_s15 = int_to_ptr.hbm [resolvable:$true] %s46_s15 }
   0x8   :  { %26 = dma.hbm_to_vmem [thread:$0]  %s22_s8, 128, %s24_s12, [#allocation3]  }
   0x9   :  { %s61_s17 = sshll.u32 %s449_s5, 4  ;;  %s377_s18 = smov [#allocation7]   ;;  %s62_s17 = int_to_ptr.hbm [resolvable:$true] %s61_s17 }
   0xa   :  { %s48_s19 = sshll.u32 %s377_s18, 4  ;;  %s378_s0 = smov [#allocation8]   ;;  %s49_s19 = int_to_ptr.vmem [resolvable:$true] %s48_s19 }
   0xb   :  { %54 = dma.hbm_to_vmem [thread:$0]  %s47_s15, 2048, %s49_s19, [#allocation6], %s374_s9, %s374_s9, %s375_s10  }
   0xc   :  { %s63_s20 = sshll.u32 %s378_s0, 4  ;;  %s64_s20 = int_to_ptr.vmem [resolvable:$true] %s63_s20 }
   0xd   :  { %69 = dma.hbm_to_vmem [thread:$0]  %s62_s17, 2048, %s64_s20, [#allocation9], %s374_s9, %s374_s9, %s375_s10  }
   0xe   :  { %365 = dma.done.wait [#allocation3], 128  }
   0xf   :  { %366 = vsyncadd [#allocation3], 4294967168 }
  0x10   :  { %367 = dma.done.wait [#allocation6], 4096  }
  0x11   :  { %368 = vsyncadd [#allocation6], 4294963200 }
  0x12   :  { %369 = dma.done.wait [#allocation9], 2048  }
  0x13   :  { %370 = vsyncadd [#allocation9], 4294965248  ;;  %v104_v0 = vld [vmem:[#allocation5 + $0x78] sm:$0xff]  ;;  %v103_v1 = vld [vmem:[#allocation5 + $0x70] sm:$0xff]  ;;  %s379_s24 = smov [#allocation10]   ;;  %s223_s28 = sshll.u32 %s451_s7, 4  ;;  %s224_s28 = int_to_ptr.hbm [resolvable:$true] %s223_s28 }
  0x14   :  { %109 = vmatpush.msra.mxu0 %v104_v0  ;;  %v102_v2 = vld [vmem:[#allocation5 + $0x68] sm:$0xff]  ;;  %v101_v3 = vld [vmem:[#allocation5 + $0x60] sm:$0xff]  ;;  %v147_v4 = vld [vmem:[#allocation7 + $0x78] sm:$0xff]  ;;  %s221_s25 = sshll.u32 %s379_s24, 4  ;;  %s222_s25 = int_to_ptr.vmem [resolvable:$true] %s221_s25 }
  0x15   :  { %v100_v5 = vld [vmem:[#allocation5 + $0x58] sm:$0xff]  ;;  %152 = vmatpush.msra.mxu1 %v147_v4  ;;  %v146_v6 = vld [vmem:[#allocation7 + $0x70] sm:$0xff]  ;;  %v145_v7 = vld [vmem:[#allocation7 + $0x68] sm:$0xff] }
  0x16   :  { %110 = vmatpush.msra.mxu0 %v103_v1  ;;  %v99_v8 = vld [vmem:[#allocation5 + $0x50] sm:$0xff]  ;;  %v144_v9 = vld [vmem:[#allocation7 + $0x60] sm:$0xff]  ;;  %v98_v10 = vld [vmem:[#allocation5 + $0x48] sm:$0xff] }
  0x17   :  { %153 = vmatpush.msra.mxu1 %v146_v6  ;;  %v143_v11 = vld [vmem:[#allocation7 + $0x58] sm:$0xff]  ;;  %v97_v12 = vld [vmem:[#allocation5 + $0x40] sm:$0xff]  ;;  %v142_v13 = vld [vmem:[#allocation7 + $0x50] sm:$0xff] }
  0x18   :  { %111 = vmatpush.msra.mxu0 %v102_v2  ;;  %v96_v14 = vld [vmem:[#allocation5 + $0x38] sm:$0xff]  ;;  %v141_v15 = vld [vmem:[#allocation7 + $0x48] sm:$0xff]  ;;  %v95_v16 = vld [vmem:[#allocation5 + $0x30] sm:$0xff] }
  0x19   :  { %154 = vmatpush.msra.mxu1 %v145_v7  ;;  %v140_v17 = vld [vmem:[#allocation7 + $0x40] sm:$0xff]  ;;  %v94_v18 = vld [vmem:[#allocation5 + $0x28] sm:$0xff]  ;;  %v139_v19 = vld [vmem:[#allocation7 + $0x38] sm:$0xff] }
  0x1a   :  { %112 = vmatpush.msra.mxu0 %v101_v3  ;;  %v93_v20 = vld [vmem:[#allocation5 + $0x20] sm:$0xff]  ;;  %v138_v21 = vld [vmem:[#allocation7 + $0x30] sm:$0xff]  ;;  %v92_v22 = vld [vmem:[#allocation5 + $0x18] sm:$0xff] }
  0x1b   :  { %155 = vmatpush.msra.mxu1 %v144_v9  ;;  %v137_v23 = vld [vmem:[#allocation7 + $0x28] sm:$0xff]  ;;  %v91_v24 = vld [vmem:[#allocation5 + $0x10] sm:$0xff]  ;;  %v136_v25 = vld [vmem:[#allocation7 + $0x20] sm:$0xff] }
  0x1c   :  { %113 = vmatpush.msra.mxu0 %v100_v5  ;;  %v90_v26 = vld [vmem:[#allocation5 + $0x8] sm:$0xff]  ;;  %v135_v27 = vld [vmem:[#allocation7 + $0x18] sm:$0xff]  ;;  %v89_v28 = vld [vmem:[#allocation5] sm:$0xff] }
  0x1d   :  { %156 = vmatpush.msra.mxu1 %v143_v11  ;;  %v88_v29 = vld [vmem:[#allocation2] sm:$0xff]  ;;  %v134_v30 = vld [vmem:[#allocation7 + $0x10] sm:$0xff]  ;;  %v133_v31 = vld [vmem:[#allocation7 + $0x8] sm:$0xff] }
  0x1e   :  { %114 = vmatpush.msra.mxu0 %v99_v8  ;;  %v132_v32 = vld [vmem:[#allocation7] sm:$0xff]  ;;  %v190_v33 = vld [vmem:[#allocation8 + $0x78] sm:$0xff]  ;;  %v189_v34 = vld [vmem:[#allocation8 + $0x70] sm:$0xff] }
  0x1f   :  { %157 = vmatpush.msra.mxu1 %v142_v13  ;;  %195 = vmatpush.msra.mxu2 %v190_v33  ;;  %v188_v35 = vld [vmem:[#allocation8 + $0x68] sm:$0xff]  ;;  %v187_v36 = vld [vmem:[#allocation8 + $0x60] sm:$0xff]  ;;  %v186_v37 = vld [vmem:[#allocation8 + $0x58] sm:$0xff] }
  0x20   :  { %115 = vmatpush.msra.mxu0 %v98_v10  ;;  %v185_v38 = vld [vmem:[#allocation8 + $0x50] sm:$0xff]  ;;  %v184_v39 = vld [vmem:[#allocation8 + $0x48] sm:$0xff]  ;;  %v183_v40 = vld [vmem:[#allocation8 + $0x40] sm:$0xff] }
  0x21   :  { %158 = vmatpush.msra.mxu1 %v141_v15  ;;  %196 = vmatpush.msra.mxu2 %v189_v34  ;;  %v182_v41 = vld [vmem:[#allocation8 + $0x38] sm:$0xff]  ;;  %v181_v42 = vld [vmem:[#allocation8 + $0x30] sm:$0xff]  ;;  %v180_v43 = vld [vmem:[#allocation8 + $0x28] sm:$0xff] }
  0x22   :  { %116 = vmatpush.msra.mxu0 %v97_v12  ;;  %v179_v44 = vld [vmem:[#allocation8 + $0x20] sm:$0xff]  ;;  %v178_v45 = vld [vmem:[#allocation8 + $0x18] sm:$0xff]  ;;  %v177_v51 = vld [vmem:[#allocation8 + $0x10] sm:$0xff] }
  0x23   :  { %159 = vmatpush.msra.mxu1 %v140_v17  ;;  %197 = vmatpush.msra.mxu2 %v188_v35  ;;  %v242_v46 = vld [vmem:[%s446_s2] ss:$0 sm:$0xff]  ;;  %v176_v52 = vld [vmem:[#allocation8 + $0x8] sm:$0xff]  ;;  %v175_v53 = vld [vmem:[#allocation8] sm:$0xff] }
  0x24   :  { %117 = vmatpush.msra.mxu0 %v96_v14  ;;  %v243_v54 = vld [vmem:[%s448_s4] ss:$0 sm:$0xff] }
  0x25   :  { %160 = vmatpush.msra.mxu1 %v139_v19  ;;  %198 = vmatpush.msra.mxu2 %v187_v36  ;;  %v244_v59 = vld [vmem:[%s450_s6] ss:$0 sm:$0xff] }
  0x26   :  { %118 = vmatpush.msra.mxu0 %v95_v16 }
  0x27   :  { %161 = vmatpush.msra.mxu1 %v138_v21  ;;  %199 = vmatpush.msra.mxu2 %v186_v37 }
  0x28   :  { %119 = vmatpush.msra.mxu0 %v94_v18 }
  0x29   :  { %162 = vmatpush.msra.mxu1 %v137_v23  ;;  %200 = vmatpush.msra.mxu2 %v185_v38 }
  0x2a   :  { %120 = vmatpush.msra.mxu0 %v93_v20 }
  0x2b   :  { %163 = vmatpush.msra.mxu1 %v136_v25  ;;  %201 = vmatpush.msra.mxu2 %v184_v39 }
  0x2c   :  { %121 = vmatpush.msra.mxu0 %v92_v22 }
  0x2d   :  { %164 = vmatpush.msra.mxu1 %v135_v27  ;;  %202 = vmatpush.msra.mxu2 %v183_v40 }
  0x2e   :  { %122 = vmatpush.msra.mxu0 %v91_v24 }
  0x2f   :  { %165 = vmatpush.msra.mxu1 %v134_v30  ;;  %203 = vmatpush.msra.mxu2 %v182_v41 }
  0x30   :  { %123 = vmatpush.msra.mxu0 %v90_v26 }
  0x31   :  { %166 = vmatpush.msra.mxu1 %v133_v31  ;;  %204 = vmatpush.msra.mxu2 %v181_v42 }
  0x32   :  { %124 = vmatpush.msra.mxu0 %v89_v28 }
  0x33   :  { %125 = vmatmul.f32.vlgmr.msra.gmra.mxu0 %v88_v29  ;;  %167 = vmatpush.msra.mxu1 %v132_v32 }
  0x34   :  { %205 = vmatpush.msra.mxu2 %v180_v43 }
  0x36   :  { %206 = vmatpush.msra.mxu2 %v179_v44 }
  0x38   :  { %207 = vmatpush.msra.mxu2 %v178_v45 }
  0x3a   :  { %208 = vmatpush.msra.mxu2 %v177_v51 }
  0x3c   :  { %209 = vmatpush.msra.mxu2 %v176_v52 }
  0x3e   :  { %210 = vmatpush.msra.mxu2 %v175_v53 }
  0xb0   :  { %v126_v47 = vpop.f32.mrf.mxu0 }
  0xb1   :  { %v127_v48 = vadd.f32 %v242_v46, %v126_v47 }
  0xb3   :  { %vm129_vm0 = vcmp.gt.f32.partialorder %v127_v48, 0.0  ;;  %v130_v49 = vmul.f32 0.01, %v127_v48 }
  0xb5   :  { %v131_v50 = vsel %vm129_vm0, %v127_v48, %v130_v49 }
  0xb6   :  { %168 = vmatmul.f32.vlgmr.msra.gmra.mxu1 %v131_v50 }
 0x133   :  { %v169_v55 = vpop.f32.mrf.mxu1 }
 0x134   :  { %v170_v56 = vadd.f32 %v243_v54, %v169_v55 }
 0x136   :  { %vm172_vm1 = vcmp.gt.f32.partialorder %v170_v56, 0.0  ;;  %v173_v57 = vmul.f32 0.01, %v170_v56 }
 0x138   :  { %v174_v58 = vsel %vm172_vm1, %v170_v56, %v173_v57 }
 0x139   :  { %211 = vmatmul.f32.vlgmr.msra.gmra.mxu2 %v174_v58 }
 0x1bc   :  { %v212_v60 = vpop.f32.mrf.mxu2 }
 0x1bd   :  { %v213_v61 = vadd.f32 %v244_v59, %v212_v60 }
 0x1bf   :  { %215 = vst [vmem:[#allocation10] sm:$0xff] %v213_v61 }
 0x1c0   :  { %226 = dma.vmem_to_hbm [thread:$0]  %s222_s25, 128, %s224_s28, [#allocation4]  }
 0x1c1   :  { %371 = dma.done.wait [#allocation4], 128  }
 0x1c2   :  { %372 = vsyncadd [#allocation4], 4294967168 }
 0x1c3   :  { %231 = vsyncpa [#allocation3], 1 }
 0x1c4   :  { %232 = vsyncpa [#allocation6], 1 }
 0x1c5   :  { %233 = vsyncpa [#allocation9], 1 }
 0x1c6   :  { %234 = vsyncpa [#allocation4], 1 }

// kernel: tpu_custom_call.1
= control target key start
LH: loop header
LB: loop body
LE: loop exit
PB: predicated region body
PF: predicated region fallthrough
CT: control target
= control target key end

     0   :  { %12 = vsyncpa [#allocation3], 0  ;;  %s444_s0 = inlined_call_operand.hbm [shape: f32[8,128], index: 0, kind: input, shape index: {}]   ;;  %s445_s1 = inlined_call_operand.hbm [shape: f32[128,128], index: 1, kind: input, shape index: {}]   ;;  %s446_s2 = inlined_call_operand.vmem [shape: f32[1,128], index: 2, kind: input, shape index: {}]   ;;  %s447_s3 = inlined_call_operand.hbm [shape: f32[1,128,128], index: 3, kind: input, shape index: {}]   ;;  %s448_s4 = inlined_call_operand.vmem [shape: f32[1,1,128], index: 4, kind: input, shape index: {}]   ;;  %s449_s5 = inlined_call_operand.hbm [shape: f32[128,128], index: 5, kind: input, shape index: {}]   ;;  %s450_s6 = inlined_call_operand.vmem [shape: f32[1,128], index: 6, kind: input, shape index: {}]   ;;  %s451_s7 = inlined_call_operand.hbm [shape: f32[8,128], index: 7, kind: output, shape index: {}]  }
   0x1   :  { %13 = vsyncpa [#allocation6], 0 }
   0x2   :  { %14 = vsyncpa [#allocation9], 0  ;;  %s31_s26 = sshll.u32 %s445_s1, 4  ;;  %s32_s26 = int_to_ptr.hbm [resolvable:$true] %s31_s26 }
   0x3   :  { %15 = vsyncpa [#allocation4], 0  ;;  %s373_s27 = smov [#allocation5]   ;;  %s21_s8 = sshll.u32 %s444_s0, 4  ;;  %s22_s8 = int_to_ptr.hbm [resolvable:$true] %s21_s8 }
   0x4   :  { %s33_s28 = sshll.u32 %s373_s27, 4  ;;  %s374_s9 = smov 128   ;;  %s34_s28 = int_to_ptr.vmem [resolvable:$true] %s33_s28 }
   0x5   :  { %s375_s10 = smov 8   ;;  %s376_s11 = smov [#allocation2]  }
   0x6   :  { %39 = dma.hbm_to_vmem [thread:$0]  %s32_s26, 2048, %s34_s28, [#allocation6], %s374_s9, %s374_s9, %s375_s10  }
   0x7   :  { %s23_s12 = sshll.u32 %s376_s11, 4  ;;  %s46_s15 = sshll.u32 %s447_s3, 4  ;;  %s24_s12 = int_to_ptr.vmem [resolvable:$true] %s23_s12  ;;  %s47_s15 = int_to_ptr.hbm [resolvable:$true] %s46_s15 }
   0x8   :  { %26 = dma.hbm_to_vmem [thread:$0]  %s22_s8, 128, %s24_s12, [#allocation3]  }
   0x9   :  { %s61_s17 = sshll.u32 %s449_s5, 4  ;;  %s377_s18 = smov [#allocation7]   ;;  %s62_s17 = int_to_ptr.hbm [resolvable:$true] %s61_s17 }
   0xa   :  { %s48_s19 = sshll.u32 %s377_s18, 4  ;;  %s378_s0 = smov [#allocation8]   ;;  %s49_s19 = int_to_ptr.vmem [resolvable:$true] %s48_s19 }
   0xb   :  { %54 = dma.hbm_to_vmem [thread:$0]  %s47_s15, 2048, %s49_s19, [#allocation6], %s374_s9, %s374_s9, %s375_s10  }
   0xc   :  { %s63_s20 = sshll.u32 %s378_s0, 4  ;;  %s64_s20 = int_to_ptr.vmem [resolvable:$true] %s63_s20 }
   0xd   :  { %69 = dma.hbm_to_vmem [thread:$0]  %s62_s17, 2048, %s64_s20, [#allocation9], %s374_s9, %s374_s9, %s375_s10  }
   0xe   :  { %365 = dma.done.wait [#allocation3], 128  }
   0xf   :  { %366 = vsyncadd [#allocation3], 4294967168 }
  0x10   :  { %367 = dma.done.wait [#allocation6], 4096  }
  0x11   :  { %368 = vsyncadd [#allocation6], 4294963200 }
  0x12   :  { %369 = dma.done.wait [#allocation9], 2048  }
  0x13   :  { %370 = vsyncadd [#allocation9], 4294965248  ;;  %v104_v0 = vld [vmem:[#allocation5 + $0x78] sm:$0xff]  ;;  %v103_v1 = vld [vmem:[#allocation5 + $0x70] sm:$0xff]  ;;  %s379_s24 = smov [#allocation10]   ;;  %s223_s28 = sshll.u32 %s451_s7, 4  ;;  %s224_s28 = int_to_ptr.hbm [resolvable:$true] %s223_s28 }
  0x14   :  { %109 = vmatpush.msra.mxu0 %v104_v0  ;;  %v102_v2 = vld [vmem:[#allocation5 + $0x68] sm:$0xff]  ;;  %v101_v3 = vld [vmem:[#allocation5 + $0x60] sm:$0xff]  ;;  %v147_v4 = vld [vmem:[#allocation7 + $0x78] sm:$0xff]  ;;  %s221_s25 = sshll.u32 %s379_s24, 4  ;;  %s222_s25 = int_to_ptr.vmem [resolvable:$true] %s221_s25 }
  0x15   :  { %v100_v5 = vld [vmem:[#allocation5 + $0x58] sm:$0xff]  ;;  %152 = vmatpush.msra.mxu1 %v147_v4  ;;  %v146_v6 = vld [vmem:[#allocation7 + $0x70] sm:$0xff]  ;;  %v145_v7 = vld [vmem:[#allocation7 + $0x68] sm:$0xff] }
  0x16   :  { %110 = vmatpush.msra.mxu0 %v103_v1  ;;  %v99_v8 = vld [vmem:[#allocation5 + $0x50] sm:$0xff]  ;;  %v144_v9 = vld [vmem:[#allocation7 + $0x60] sm:$0xff]  ;;  %v98_v10 = vld [vmem:[#allocation5 + $0x48] sm:$0xff] }
  0x17   :  { %153 = vmatpush.msra.mxu1 %v146_v6  ;;  %v143_v11 = vld [vmem:[#allocation7 + $0x58] sm:$0xff]  ;;  %v97_v12 = vld [vmem:[#allocation5 + $0x40] sm:$0xff]  ;;  %v142_v13 = vld [vmem:[#allocation7 + $0x50] sm:$0xff] }
  0x18   :  { %111 = vmatpush.msra.mxu0 %v102_v2  ;;  %v96_v14 = vld [vmem:[#allocation5 + $0x38] sm:$0xff]  ;;  %v141_v15 = vld [vmem:[#allocation7 + $0x48] sm:$0xff]  ;;  %v95_v16 = vld [vmem:[#allocation5 + $0x30] sm:$0xff] }
  0x19   :  { %154 = vmatpush.msra.mxu1 %v145_v7  ;;  %v140_v17 = vld [vmem:[#allocation7 + $0x40] sm:$0xff]  ;;  %v94_v18 = vld [vmem:[#allocation5 + $0x28] sm:$0xff]  ;;  %v139_v19 = vld [vmem:[#allocation7 + $0x38] sm:$0xff] }
  0x1a   :  { %112 = vmatpush.msra.mxu0 %v101_v3  ;;  %v93_v20 = vld [vmem:[#allocation5 + $0x20] sm:$0xff]  ;;  %v138_v21 = vld [vmem:[#allocation7 + $0x30] sm:$0xff]  ;;  %v92_v22 = vld [vmem:[#allocation5 + $0x18] sm:$0xff] }
  0x1b   :  { %155 = vmatpush.msra.mxu1 %v144_v9  ;;  %v137_v23 = vld [vmem:[#allocation7 + $0x28] sm:$0xff]  ;;  %v91_v24 = vld [vmem:[#allocation5 + $0x10] sm:$0xff]  ;;  %v136_v25 = vld [vmem:[#allocation7 + $0x20] sm:$0xff] }
  0x1c   :  { %113 = vmatpush.msra.mxu0 %v100_v5  ;;  %v90_v26 = vld [vmem:[#allocation5 + $0x8] sm:$0xff]  ;;  %v135_v27 = vld [vmem:[#allocation7 + $0x18] sm:$0xff]  ;;  %v89_v28 = vld [vmem:[#allocation5] sm:$0xff] }
  0x1d   :  { %156 = vmatpush.msra.mxu1 %v143_v11  ;;  %v88_v29 = vld [vmem:[#allocation2] sm:$0xff]  ;;  %v134_v30 = vld [vmem:[#allocation7 + $0x10] sm:$0xff]  ;;  %v133_v31 = vld [vmem:[#allocation7 + $0x8] sm:$0xff] }
  0x1e   :  { %114 = vmatpush.msra.mxu0 %v99_v8  ;;  %v132_v32 = vld [vmem:[#allocation7] sm:$0xff]  ;;  %v190_v33 = vld [vmem:[#allocation8 + $0x78] sm:$0xff]  ;;  %v189_v34 = vld [vmem:[#allocation8 + $0x70] sm:$0xff] }
  0x1f   :  { %157 = vmatpush.msra.mxu1 %v142_v13  ;;  %195 = vmatpush.msra.mxu2 %v190_v33  ;;  %v188_v35 = vld [vmem:[#allocation8 + $0x68] sm:$0xff]  ;;  %v187_v36 = vld [vmem:[#allocation8 + $0x60] sm:$0xff]  ;;  %v186_v37 = vld [vmem:[#allocation8 + $0x58] sm:$0xff] }
  0x20   :  { %115 = vmatpush.msra.mxu0 %v98_v10  ;;  %v185_v38 = vld [vmem:[#allocation8 + $0x50] sm:$0xff]  ;;  %v184_v39 = vld [vmem:[#allocation8 + $0x48] sm:$0xff]  ;;  %v183_v40 = vld [vmem:[#allocation8 + $0x40] sm:$0xff] }
  0x21   :  { %158 = vmatpush.msra.mxu1 %v141_v15  ;;  %196 = vmatpush.msra.mxu2 %v189_v34  ;;  %v182_v41 = vld [vmem:[#allocation8 + $0x38] sm:$0xff]  ;;  %v181_v42 = vld [vmem:[#allocation8 + $0x30] sm:$0xff]  ;;  %v180_v43 = vld [vmem:[#allocation8 + $0x28] sm:$0xff] }
  0x22   :  { %116 = vmatpush.msra.mxu0 %v97_v12  ;;  %v179_v44 = vld [vmem:[#allocation8 + $0x20] sm:$0xff]  ;;  %v178_v45 = vld [vmem:[#allocation8 + $0x18] sm:$0xff]  ;;  %v177_v51 = vld [vmem:[#allocation8 + $0x10] sm:$0xff] }
  0x23   :  { %159 = vmatpush.msra.mxu1 %v140_v17  ;;  %197 = vmatpush.msra.mxu2 %v188_v35  ;;  %v242_v46 = vld [vmem:[%s446_s2] ss:$0 sm:$0xff]  ;;  %v176_v52 = vld [vmem:[#allocation8 + $0x8] sm:$0xff]  ;;  %v175_v53 = vld [vmem:[#allocation8] sm:$0xff] }
  0x24   :  { %117 = vmatpush.msra.mxu0 %v96_v14  ;;  %v243_v54 = vld [vmem:[%s448_s4] ss:$0 sm:$0xff] }
  0x25   :  { %160 = vmatpush.msra.mxu1 %v139_v19  ;;  %198 = vmatpush.msra.mxu2 %v187_v36  ;;  %v244_v59 = vld [vmem:[%s450_s6] ss:$0 sm:$0xff] }
  0x26   :  { %118 = vmatpush.msra.mxu0 %v95_v16 }
  0x27   :  { %161 = vmatpush.msra.mxu1 %v138_v21  ;;  %199 = vmatpush.msra.mxu2 %v186_v37 }
  0x28   :  { %119 = vmatpush.msra.mxu0 %v94_v18 }
  0x29   :  { %162 = vmatpush.msra.mxu1 %v137_v23  ;;  %200 = vmatpush.msra.mxu2 %v185_v38 }
  0x2a   :  { %120 = vmatpush.msra.mxu0 %v93_v20 }
  0x2b   :  { %163 = vmatpush.msra.mxu1 %v136_v25  ;;  %201 = vmatpush.msra.mxu2 %v184_v39 }
  0x2c   :  { %121 = vmatpush.msra.mxu0 %v92_v22 }
  0x2d   :  { %164 = vmatpush.msra.mxu1 %v135_v27  ;;  %202 = vmatpush.msra.mxu2 %v183_v40 }
  0x2e   :  { %122 = vmatpush.msra.mxu0 %v91_v24 }
  0x2f   :  { %165 = vmatpush.msra.mxu1 %v134_v30  ;;  %203 = vmatpush.msra.mxu2 %v182_v41 }
  0x30   :  { %123 = vmatpush.msra.mxu0 %v90_v26 }
  0x31   :  { %166 = vmatpush.msra.mxu1 %v133_v31  ;;  %204 = vmatpush.msra.mxu2 %v181_v42 }
  0x32   :  { %124 = vmatpush.msra.mxu0 %v89_v28 }
  0x33   :  { %125 = vmatmul.f32.vlgmr.msra.gmra.mxu0 %v88_v29  ;;  %167 = vmatpush.msra.mxu1 %v132_v32 }
  0x34   :  { %205 = vmatpush.msra.mxu2 %v180_v43 }
  0x36   :  { %206 = vmatpush.msra.mxu2 %v179_v44 }
  0x38   :  { %207 = vmatpush.msra.mxu2 %v178_v45 }
  0x3a   :  { %208 = vmatpush.msra.mxu2 %v177_v51 }
  0x3c   :  { %209 = vmatpush.msra.mxu2 %v176_v52 }
  0x3e   :  { %210 = vmatpush.msra.mxu2 %v175_v53 }
  0xb0   :  { %v126_v47 = vpop.f32.mrf.mxu0 }
  0xb1   :  { %v127_v48 = vadd.f32 %v242_v46, %v126_v47 }
  0xb3   :  { %vm129_vm0 = vcmp.gt.f32.partialorder %v127_v48, 0.0  ;;  %v130_v49 = vmul.f32 0.01, %v127_v48 }
  0xb5   :  { %v131_v50 = vsel %vm129_vm0, %v127_v48, %v130_v49 }
  0xb6   :  { %168 = vmatmul.f32.vlgmr.msra.gmra.mxu1 %v131_v50 }
 0x133   :  { %v169_v55 = vpop.f32.mrf.mxu1 }
 0x134   :  { %v170_v56 = vadd.f32 %v243_v54, %v169_v55 }
 0x136   :  { %vm172_vm1 = vcmp.gt.f32.partialorder %v170_v56, 0.0  ;;  %v173_v57 = vmul.f32 0.01, %v170_v56 }
 0x138   :  { %v174_v58 = vsel %vm172_vm1, %v170_v56, %v173_v57 }
 0x139   :  { %211 = vmatmul.f32.vlgmr.msra.gmra.mxu2 %v174_v58 }
 0x1bc   :  { %v212_v60 = vpop.f32.mrf.mxu2 }
 0x1bd   :  { %v213_v61 = vadd.f32 %v244_v59, %v212_v60 }
 0x1bf   :  { %215 = vst [vmem:[#allocation10] sm:$0xff] %v213_v61 }
 0x1c0   :  { %226 = dma.vmem_to_hbm [thread:$0]  %s222_s25, 128, %s224_s28, [#allocation4]  }
 0x1c1   :  { %371 = dma.done.wait [#allocation4], 128  }
 0x1c2   :  { %372 = vsyncadd [#allocation4], 4294967168 }
 0x1c3   :  { %231 = vsyncpa [#allocation3], 1 }
 0x1c4   :  { %232 = vsyncpa [#allocation6], 1 }
 0x1c5   :  { %233 = vsyncpa [#allocation9], 1 }
 0x1c6   :  { %234 = vsyncpa [#allocation4], 1 }

</bundles_post_ra>
